<compile_context>
chip_gen: v5e
topology: v5e:2x2
jax: 0.10.0
libtpu: 0.0.40
codegen_flags: <defaults>
</compile_context>

<pallas_src>
import jax
import jax.numpy as jnp
from jax.experimental import pallas as pl
from jax.experimental.pallas import tpu as pltpu


def _linear_kernel(x_ref, w_ref, b_ref, o_ref, acc_ref):
    k = pl.program_id(2)

    @pl.when(k == 0)
    def _init():
        # Fold the bias into the accumulator init so the epilogue is a pure
        # cast + store (removes a (tm, tn) VPU add from the last-K critical path).
        acc_ref[...] = jnp.broadcast_to(
            b_ref[...].astype(jnp.float32), acc_ref.shape
        )

    # Pure MXU push in the inner K loop; f32 accumulation in VMEM scratch.
    acc_ref[...] += jnp.dot(
        x_ref[...], w_ref[...], preferred_element_type=jnp.float32
    )

    @pl.when(k == pl.num_programs(2) - 1)
    def _finalize():
        o_ref[...] = acc_ref[...].astype(o_ref.dtype)


def _round_up(x: int, m: int) -> int:
    return (x + m - 1) // m * m


def _chip_config():
    """Per-generation tile caps and scoped-VMEM limit."""
    try:
        kind = jax.devices()[0].device_kind.lower()
    except Exception:  # pragma: no cover
        kind = ""
    if "7" in kind:
        # v7x: 64 MiB VMEM per TensorCore, 3.2 TB/s HBM, 2 TCs/chip.
        return {"tm": 512, "tn": 512, "tk": 1024,
                "vmem_limit": 56 << 20, "split_for_cores": True}
    if "v5" in kind or "v6" in kind:
        # v5e/v6e: 128 MiB physical VMEM -> big tiles, raised scoped limit.
        return {"tm": 512, "tn": 1024, "tk": 2048,
                "vmem_limit": 80 << 20, "split_for_cores": False}
    # Unknown / older parts: moderate tiles, default scoped VMEM limit.
    return {"tm": 256, "tn": 512, "tk": 1024,
            "vmem_limit": None, "split_for_cores": False}


def _select_tiles(M, K, N, cfg, tm, tn, tk):
    cap_tm, cap_tn, cap_tk = cfg["tm"], cfg["tn"], cfg["tk"]

    # Weight (K x N) is the usually-dominant operand and is re-read
    # ceil(M/tm) times, so tm gets the largest cap; tn second.
    if tm is None:
        tm = min(cap_tm, _round_up(M, 8))
    if tn is None:
        tn = min(cap_tn, _round_up(N, 128))

    if tk is None:
        if K <= cap_tk:
            # Single K block equal to the full array dim: no K padding needed,
            # even when K is not a multiple of 128.
            tk = K
        elif K % 128 == 0:
            # Largest multiple of 128 <= cap that divides K (128 always does),
            # so the common in_features (768/1024/4096/...) need no K padding.
            tk = 128
            for cand in range(cap_tk - cap_tk % 128, 127, -128):
                if K % cand == 0:
                    tk = cand
                    break
        else:
            tk = cap_tk  # rare: huge ragged K -> zero-pad K up to a tile grid
    Kp = _round_up(K, tk)

    # Megacore (v7x has 2 TensorCores): ensure >=2 blocks along the parallel
    # axes when the problem is big enough that idling a core would matter.
    if (cfg["split_for_cores"]
            and pl.cdiv(M, tm) * pl.cdiv(N, tn) < 2
            and 2 * M * N * K >= (1 << 27)):
        if N >= 256:
            tn = max(128, _round_up((N + 1) // 2, 128))
        elif M >= 16:
            tm = max(8, _round_up((M + 1) // 2, 8))

    return tm, tn, tk, Kp


def linear_forward(
    x: jax.Array,
    weight: jax.Array,
    bias: jax.Array,
    *,
    compute_dtype=None,   # e.g. jnp.bfloat16 for 2-4x MXU throughput (opt-in)
    tm: int | None = None,
    tn: int | None = None,
    tk: int | None = None,
) -> jax.Array:
    """out = x @ weight + bias, computed in a tiled Pallas TPU kernel."""
    orig_shape = x.shape
    out_dtype = x.dtype
    if x.ndim != 2:
        x = x.reshape(-1, x.shape[-1])

    M, K = x.shape
    K2, N = weight.shape
    assert K == K2, f"in_features mismatch: {K} vs {K2}"
    assert bias.shape == (N,), f"bias shape {bias.shape} != ({N},)"

    if compute_dtype is not None:
        x = x.astype(compute_dtype)
        weight = weight.astype(compute_dtype)

    cfg = _chip_config()
    tm, tn, tk, Kp = _select_tiles(M, K, N, cfg, tm, tn, tk)

    # Only K ever needs zero-padding (garbage in padded K lanes would corrupt
    # valid outputs; padded M/N only pollutes rows/cols Pallas masks on store).
    if Kp != K:
        x = jnp.pad(x, ((0, 0), (0, Kp - K)))
        weight = jnp.pad(weight, ((0, Kp - K), (0, 0)))

    bias2d = bias.reshape(1, N).astype(jnp.float32)

    grid = (pl.cdiv(M, tm), pl.cdiv(N, tn), Kp // tk)

    in_bytes = x.dtype.itemsize
    cost = pl.CostEstimate(
        flops=2 * M * N * K,
        bytes_accessed=in_bytes * (M * K + K * N)
        + 4 * N
        + out_dtype.itemsize * M * N,
        transcendentals=0,
    )

    cp_kwargs = {"dimension_semantics": ("parallel", "parallel", "arbitrary")}
    if cfg["vmem_limit"] is not None:
        cp_kwargs["vmem_limit_bytes"] = cfg["vmem_limit"]

    out = pl.pallas_call(
        _linear_kernel,
        out_shape=jax.ShapeDtypeStruct((M, N), out_dtype),
        grid_spec=pltpu.PrefetchScalarGridSpec(
            num_scalar_prefetch=0,
            grid=grid,
            in_specs=[
                pl.BlockSpec((tm, tk), lambda i, j, k: (i, k)),
                pl.BlockSpec((tk, tn), lambda i, j, k: (k, j)),
                pl.BlockSpec((1, tn), lambda i, j, k: (0, j)),
            ],
            out_specs=pl.BlockSpec((tm, tn), lambda i, j, k: (i, j)),
            scratch_shapes=[pltpu.VMEM((tm, tn), jnp.float32)],
        ),
        compiler_params=pltpu.CompilerParams(**cp_kwargs),
        cost_estimate=cost,
    )(x, weight, bias2d)

    if len(orig_shape) != 2:
        out = out.reshape(*orig_shape[:-1], N)
    return out


if __name__ == "__main__":
    key = jax.random.PRNGKey(0)

    # --- Small shapes matching the module's intended use: (batch, in) x (in, out) ---
    batch, in_features, out_features = 8, 32, 64
    kx, kw, kb = jax.random.split(key, 3)
    x = jax.random.normal(kx, (batch, in_features), dtype=jnp.float32)
    weight = jax.random.normal(kw, (in_features, out_features), dtype=jnp.float32)
    bias = jax.random.normal(kb, (out_features,), dtype=jnp.float32)

    out = jax.block_until_ready(linear_forward(x, weight, bias))
    ref = x @ weight + bias
    assert out.shape == (batch, out_features)
    assert jnp.allclose(out, ref, atol=1e-5, rtol=1e-5)

    # --- Non-tile-aligned shape: partial M/N edge blocks, no M/N/K padding ---
    M2, K2, N2 = 136, 200, 320
    kx2, kw2, kb2 = jax.random.split(jax.random.PRNGKey(1), 3)
    x2 = jax.random.normal(kx2, (M2, K2), dtype=jnp.float32)
    w2 = jax.random.normal(kw2, (K2, N2), dtype=jnp.float32)
    b2 = jax.random.normal(kb2, (N2,), dtype=jnp.float32)

    out2 = jax.block_until_ready(linear_forward(x2, w2, b2))
    ref2 = x2 @ w2 + b2
    assert out2.shape == (M2, N2)
    assert jnp.allclose(out2, ref2, atol=1e-3, rtol=1e-4)

    # --- Force a multi-block grid (2, 2, 3) to exercise the K-accumulator path
    #     and masked partial-N stores with explicit small tile overrides. ---
    M3, K3, N3 = 64, 384, 192
    kx3, kw3, kb3 = jax.random.split(jax.random.PRNGKey(2), 3)
    x3 = jax.random.normal(kx3, (M3, K3), dtype=jnp.float32)
    w3 = jax.random.normal(kw3, (K3, N3), dtype=jnp.float32)
    b3 = jax.random.normal(kb3, (N3,), dtype=jnp.float32)

    out3 = jax.block_until_ready(linear_forward(x3, w3, b3, tm=32, tn=128, tk=128))
    ref3 = x3 @ w3 + b3
    assert out3.shape == (M3, N3)
    assert jnp.allclose(out3, ref3, atol=1e-3, rtol=1e-4)

    print("KERNEL_OK")
</pallas_src>

<mosaic_0001>
module attributes {stable_mosaic.version = 11 : i64} {
  func.func @_linear_kernel(%arg0: i32, %arg1: i32, %arg2: i32, %arg3: memref<8x32xf32, #tpu.memory_space<vmem>>, %arg4: memref<32x128xf32, #tpu.memory_space<vmem>>, %arg5: memref<1x128xf32, #tpu.memory_space<vmem>>, %arg6: memref<8x128xf32, #tpu.memory_space<vmem>>, %arg7: memref<8x128xf32, #tpu.memory_space<vmem>>) attributes {dimension_semantics = [#tpu.dimension_semantics<parallel>, #tpu.dimension_semantics<parallel>, #tpu.dimension_semantics<arbitrary>], iteration_bounds = array<i64: 1, 1, 1>, scalar_prefetch = 0 : i64, scratch_operands = 1 : i64, tpu.core_type = #tpu.core_type<tc>, window_params = [{transform_indices = @transform_0, window_bounds = array<i64: 8, 32>}, {transform_indices = @transform_1, window_bounds = array<i64: 32, 128>}, {transform_indices = @transform_2, window_bounds = array<i64: 1, 128>}, {transform_indices = @transform_3, window_bounds = array<i64: 8, 128>}]} {
    %c0_i32 = arith.constant 0 : i32
    %0 = arith.cmpi eq, %arg2, %c0_i32 : i32
    %1 = arith.extui %0 : i1 to i32
    %c0_i32_0 = arith.constant 0 : i32
    %2 = arith.cmpi ne, %1, %c0_i32_0 : i32
    scf.if %2 {
      %c0_10 = arith.constant 0 : index
      %c0_11 = arith.constant 0 : index
      %12 = vector.load %arg5[%c0_10, %c0_11] : memref<1x128xf32, #tpu.memory_space<vmem>>, vector<1x128xf32>
      %13 = vector.shape_cast %12 : vector<1x128xf32> to vector<1x128xf32>
      %14 = vector.broadcast %13 : vector<1x128xf32> to vector<8x128xf32>
      %c0_12 = arith.constant 0 : index
      %c0_13 = arith.constant 0 : index
      %15 = vector.load %arg7[%c0_12, %c0_13] : memref<8x128xf32, #tpu.memory_space<vmem>>, vector<8x128xf32>
      tpu.vector_store %arg7[%c0_12, %c0_13], %14 {strides = array<i32>} : memref<8x128xf32, #tpu.memory_space<vmem>>, vector<8x128xf32>,
    } else {
    }
    %c0 = arith.constant 0 : index
    %c0_1 = arith.constant 0 : index
    %3 = vector.load %arg7[%c0, %c0_1] : memref<8x128xf32, #tpu.memory_space<vmem>>, vector<8x128xf32>
    %c0_2 = arith.constant 0 : index
    %c0_3 = arith.constant 0 : index
    %4 = vector.load %arg3[%c0_2, %c0_3] : memref<8x32xf32, #tpu.memory_space<vmem>>, vector<8x32xf32>
    %c0_4 = arith.constant 0 : index
    %c0_5 = arith.constant 0 : index
    %5 = vector.load %arg4[%c0_4, %c0_5] : memref<32x128xf32, #tpu.memory_space<vmem>>, vector<32x128xf32>
    %cst = arith.constant dense<0.000000e+00> : vector<8x128xf32>
    %6 = tpu.matmul %4, %5, %cst {dimension_numbers = #tpu.dot_dimension_numbers<[1], [0], [0], [1], [0, 0, 1, 1], [], []>} : vector<8x32xf32>, vector<32x128xf32>, vector<8x128xf32> -> vector<8x128xf32>
    %7 = arith.addf %3, %6 : vector<8x128xf32>
    %c0_6 = arith.constant 0 : index
    %c0_7 = arith.constant 0 : index
    %8 = vector.load %arg7[%c0_6, %c0_7] : memref<8x128xf32, #tpu.memory_space<vmem>>, vector<8x128xf32>
    tpu.vector_store %arg7[%c0_6, %c0_7], %7 {strides = array<i32>} : memref<8x128xf32, #tpu.memory_space<vmem>>, vector<8x128xf32>,
    %c0_i32_8 = arith.constant 0 : i32
    %9 = arith.cmpi eq, %arg2, %c0_i32_8 : i32
    %10 = arith.extui %9 : i1 to i32
    %c0_i32_9 = arith.constant 0 : i32
    %11 = arith.cmpi ne, %10, %c0_i32_9 : i32
    scf.if %11 {
      %c0_10 = arith.constant 0 : index
      %c0_11 = arith.constant 0 : index
      %12 = vector.load %arg7[%c0_10, %c0_11] : memref<8x128xf32, #tpu.memory_space<vmem>>, vector<8x128xf32>
      %c0_12 = arith.constant 0 : index
      %c0_13 = arith.constant 0 : index
      %13 = vector.load %arg6[%c0_12, %c0_13] : memref<8x128xf32, #tpu.memory_space<vmem>>, vector<8x128xf32>
      tpu.vector_store %arg6[%c0_12, %c0_13], %12 {strides = array<i32>} : memref<8x128xf32, #tpu.memory_space<vmem>>, vector<8x128xf32>,
    } else {
    }
    return
  }
  func.func @transform_0(%arg0: i32, %arg1: i32, %arg2: i32) -> (i32, i32) {
    %c0_i32 = arith.constant 0 : i32
    return %arg0, %arg2 : i32, i32
  }
  func.func @transform_1(%arg0: i32, %arg1: i32, %arg2: i32) -> (i32, i32) {
    %c0_i32 = arith.constant 0 : i32
    return %arg2, %arg1 : i32, i32
  }
  func.func @transform_2(%arg0: i32, %arg1: i32, %arg2: i32) -> (i32, i32) {
    %c0_i32 = arith.constant 0 : i32
    %c0_i32_0 = arith.constant 0 : i32
    return %c0_i32, %arg1 : i32, i32
  }
  func.func @transform_3(%arg0: i32, %arg1: i32, %arg2: i32) -> (i32, i32) {
    %c0_i32 = arith.constant 0 : i32
    return %arg0, %arg1 : i32, i32
  }
}

</mosaic_0001>

<bundles_post_ra>
// kernel: tpu_custom_call.1
= control target key start
LH: loop header
LB: loop body
LE: loop exit
PB: predicated region body
PF: predicated region fallthrough
CT: control target
= control target key end

     0   :  { %8 = vsyncpa [#allocation4], 0  ;;  %s231_s0 = inlined_call_operand.hbm [shape: f32[8,32], index: 0, kind: input, shape index: {}]   ;;  %s232_s1 = inlined_call_operand.hbm [shape: f32[32,64], index: 1, kind: input, shape index: {}]   ;;  %s233_s2 = inlined_call_operand.vmem [shape: f32[1,64], index: 2, kind: input, shape index: {}]   ;;  %s234_s3 = inlined_call_operand.hbm [shape: f32[8,64], index: 3, kind: output, shape index: {}]  }
   0x1   :  { %9 = vsyncpa [#allocation7], 0 }
   0x2   :  { %10 = vsyncpa [#allocation5], 0  ;;  %s16_s14 = sshll.u32 %s231_s0, 4  ;;  %s194_s15 = smov [#allocation3]   ;;  %s17_s14 = int_to_ptr.hbm [resolvable:$true] %s16_s14 }
   0x3   :  { %s18_s16 = sshll.u32 %s194_s15, 4  ;;  %s26_s19 = sshll.u32 %s232_s1, 4  ;;  %s19_s16 = int_to_ptr.vmem [resolvable:$true] %s18_s16  ;;  %s27_s19 = int_to_ptr.hbm [resolvable:$true] %s26_s19 }
   0x4   :  { %21 = dma.hbm_to_vmem [thread:$0]  %s17_s14, 128, %s19_s16, [#allocation4]  }
   0x5   :  { %s195_s20 = smov [#allocation6]   ;;  %s196_s22 = smov 128  }
   0x6   :  { %s28_s21 = sshll.u32 %s195_s20, 4  ;;  %s197_s23 = smov 8   ;;  %s29_s21 = int_to_ptr.vmem [resolvable:$true] %s28_s21 }
   0x7   :  { %34 = dma.hbm_to_vmem [thread:$0]  %s27_s19, 512, %s29_s21, [#allocation7], %s196_s22, %s196_s22, %s197_s23  }
   0x8   :  { %188 = dma.done.wait [#allocation4], 128  }
   0x9   :  { %189 = vsyncadd [#allocation4], 4294967168 }
   0xa   :  { %190 = dma.done.wait [#allocation7], 512  }
   0xb   :  { %191 = vsyncadd [#allocation7], 4294966784  ;;  %v59_v0 = vld [vmem:[#allocation6 + $0x18] sm:$0xff]  ;;  %v58_v1 = vld [vmem:[#allocation6 + $0x10] sm:$0xff]  ;;  %vm60_vm0 = vcmask 261120   ;;  %s198_s24 = smov [#allocation8]  }
   0xc   :  { %76 = vmatpush.msra.mxu0 %v59_v0  ;;  %v57_v2 = vld [vmem:[#allocation6 + $0x8] sm:$0xff]  ;;  %v56_v3 = vld [vmem:[#allocation6] sm:$0xff]  ;;  %v55_v4 = vld [vmem:[#allocation3] sm:$0xff]  ;;  %s96_s25 = sshll.u32 %s198_s24, 4  ;;  %s98_s28 = sshll.u32 %s234_s3, 4  ;;  %s97_s25 = int_to_ptr.vmem [resolvable:$true] %s96_s25  ;;  %s99_s28 = int_to_ptr.hbm [resolvable:$true] %s98_s28 }
   0xd   :  { %v115_v5 = vld [vmem:[%s233_s2] ss:$0 sm:$0xff] }
   0xe   :  { %77 = vmatpush.msra.mxu0 %v58_v1 }
  0x10   :  { %78 = vmatpush.msra.mxu0 %v57_v2 }
  0x12   :  { %79 = vmatpush.msra.mxu0 %v56_v3 }
  0x13   :  { %109 = vmatmul.msk.f32.vlgmr.msra.gmra.mxu0 %vm60_vm0, %v55_v4 }
  0x90   :  { %v81_v6 = vpop.f32.mrf.mxu0 }
  0x91   :  { %v84_v7 = vadd.f32 %v115_v5, %v81_v6 }
  0x93   :  { %90 = vst [vmem:[#allocation8] sm:$0xff] %v84_v7 }
  0x94   :  { %101 = dma.vmem_to_hbm [thread:$0]  %s97_s25, 128, %s99_s28, [#allocation5]  }
  0x95   :  { %192 = dma.done.wait [#allocation5], 128  }
  0x96   :  { %193 = vsyncadd [#allocation5], 4294967168 }
  0x97   :  { %106 = vsyncpa [#allocation4], 1 }
  0x98   :  { %107 = vsyncpa [#allocation7], 1 }
  0x99   :  { %108 = vsyncpa [#allocation5], 1 }

</bundles_post_ra>
